<compile_context>
chip_gen: v6e
topology: v6e:2x2x1
jax: 0.10.0
libtpu: 0.0.40
codegen_flags: <defaults>
</compile_context>

<pallas_src>
from functools import partial

import numpy as np
import jax
import jax.numpy as jnp
from jax.experimental import pallas as pl
from jax.experimental.pallas import tpu as pltpu

K = 3            # kernel_size
PAD = 1          # padding (stride=1, 'same' -> required so x1 and x2 shapes match)
LEAKY_SLOPE = 1e-4
BN_EPS = 1e-5


def _cnn2block_kernel(a_ref, xp_ref, w1_ref, b1_ref, w2_ref, b2_ref,
                      mlo_ref, mhi_ref, out_ref, x1p_ref, *, H, W, Cin, Cout):
    """One grid step = one image of the batch, channels-first lane-dense.

    a_ref   : SMEM (1,)                 -- sigmoid(a) scalar
    xp_ref  : VMEM (Cin, HW + 2*HALO)   -- zero-halo-padded flattened image
    w*_ref  : VMEM (Cout, K*K*C) bf16   -- BN-folded fused-contraction weights
    b*_ref  : VMEM (Cout, 1) f32        -- BN-folded bias
    m*_ref  : VMEM (1, HW) f32          -- row-wrap masks for the +/-1 column taps
    out_ref : VMEM (Cout, HW) f32       -- flattened NCHW output block
    x1p_ref : VMEM scratch (Cout, HW + 2*HALO) -- halo-padded x1 for conv2
    """
    HW = H * W
    HALO = W + 1

    a = a_ref[0]
    mlo = jnp.broadcast_to(mlo_ref[...], (Cin, HW))   # 0 where w == 0   (Cin == Cout)
    mhi = jnp.broadcast_to(mhi_ref[...], (Cin, HW))   # 0 where w == W-1

    def im2col(src_ref):
        # src_ref: (C, HW + 2*HALO) zero-halo-padded, lane-dense.
        # Returns the 3x3 'same'-conv im2col patch (K*K*C, HW) in bf16.
        taps = []
        for kh in range(K):
            for kw in range(K):
                s = (kh - PAD) * W + (kw - PAD)               # static lane shift
                win = src_ref[:, HALO + s:HALO + s + HW]      # (C, HW) f32 window
                if kw - PAD < 0:                              # column w-1 wraps rows
                    win = win * mlo
                elif kw - PAD > 0:                            # column w+1 wraps rows
                    win = win * mhi
                taps.append(win)
        return jnp.concatenate(taps, axis=0).astype(jnp.bfloat16)

    # ---- conv1 (+ folded BN) + LeakyReLU: one fused MXU matmul -------------
    p1 = im2col(xp_ref)                                        # (K*K*Cin, HW) bf16
    acc1 = jnp.dot(w1_ref[...], p1, preferred_element_type=jnp.float32)
    acc1 = acc1 + b1_ref[...]                                  # (Cout,1) broadcast
    x1 = jnp.where(acc1 >= 0, acc1, LEAKY_SLOPE * acc1)        # (Cout, HW) f32

    # ---- x1 -> small lane-dense halo-padded scratch for conv2 --------------
    # Only the two halo strips need zeros; the interior is fully overwritten.
    x1p_ref[:, :HALO] = jnp.zeros((Cout, HALO), jnp.float32)
    x1p_ref[:, HALO + HW:] = jnp.zeros((Cout, HALO), jnp.float32)
    x1p_ref[:, HALO:HALO + HW] = x1

    # ---- conv2 (+ folded BN) + LeakyReLU ------------------------------------
    p2 = im2col(x1p_ref)
    acc2 = jnp.dot(w2_ref[...], p2, preferred_element_type=jnp.float32)
    acc2 = acc2 + b2_ref[...]
    x2 = jnp.where(acc2 >= 0, acc2, LEAKY_SLOPE * acc2)

    # ---- blend: x1 * a + x2 * (a - 1)   (matches PyTorch cnn2Block) ---------
    out_ref[...] = x1 * a + x2 * (a - 1.0)


def cnn2block_forward(x_nchw, params):
    """PyTorch-semantics forward: x1 = cbr1(x); x2 = cbr2(x1);
    return x1*sigmoid(a) + x2*(sigmoid(a)-1).  Input/output are NCHW."""
    w1, b1 = params["w1"], params["b1"]   # (K,K,Cin,Cout), (Cout,)  (BN folded)
    w2, b2 = params["w2"], params["b2"]   # (K,K,Cout,Cout), (Cout,)
    a_param = params["a"]                 # (1,)

    N, C, H, W = x_nchw.shape
    Cout = w1.shape[-1]
    assert C == Cout, "cnn2Block requires in_ch == op_ch (cnn2 consumes cnn1 output)"
    HW = H * W
    HALO = W + 1
    HWP = HW + 2 * HALO

    # Layout plumbing only (cheap XLA reshape/pad): NCHW -> (N, C, H*W) + halo.
    x_flat = x_nchw.reshape(N, C, HW).astype(jnp.float32)
    x_pad = jnp.pad(x_flat, ((0, 0), (0, 0), (HALO, HALO)))

    a_sig = jax.nn.sigmoid(a_param).astype(jnp.float32)        # (1,) scalar glue

    # Fused-contraction weights: (Cout, K*K*Cin), bf16 for the MXU.
    w1t = jnp.transpose(w1.reshape(K * K * C, Cout)).astype(jnp.bfloat16)
    w2t = jnp.transpose(w2.reshape(K * K * Cout, Cout)).astype(jnp.bfloat16)
    b1c = b1.reshape(Cout, 1).astype(jnp.float32)
    b2c = b2.reshape(Cout, 1).astype(jnp.float32)

    # Constant row-wrap masks for the +/-1 column taps (lane-dense, (1, HW)).
    w_idx = np.arange(HW) % W
    mask_lo = jnp.asarray(w_idx >= 1, jnp.float32).reshape(1, HW)
    mask_hi = jnp.asarray(w_idx <= W - 2, jnp.float32).reshape(1, HW)

    kernel = partial(_cnn2block_kernel, H=H, W=W, Cin=C, Cout=Cout)

    out_flat = pl.pallas_call(
        kernel,
        out_shape=jax.ShapeDtypeStruct((N, Cout, HW), jnp.float32),
        grid=(N,),
        in_specs=[
            pl.BlockSpec(memory_space=pltpu.SMEM),                   # a_sig
            pl.BlockSpec((None, C, HWP), lambda n: (n, 0, 0)),       # x_pad
            pl.BlockSpec((Cout, K * K * C), lambda n: (0, 0)),       # w1t
            pl.BlockSpec((Cout, 1), lambda n: (0, 0)),               # b1
            pl.BlockSpec((Cout, K * K * Cout), lambda n: (0, 0)),    # w2t
            pl.BlockSpec((Cout, 1), lambda n: (0, 0)),               # b2
            pl.BlockSpec((1, HW), lambda n: (0, 0)),                 # mask_lo
            pl.BlockSpec((1, HW), lambda n: (0, 0)),                 # mask_hi
        ],
        out_specs=pl.BlockSpec((None, Cout, HW), lambda n: (n, 0, 0)),
        scratch_shapes=[pltpu.VMEM((Cout, HWP), jnp.float32)],
        compiler_params=pltpu.CompilerParams(
            dimension_semantics=("parallel",)),                      # megacore on v7x
    )(a_sig, x_pad, w1t, b1c, w2t, b2c, mask_lo, mask_hi)

    return out_flat.reshape(N, Cout, H, W)                           # already NCHW


# ------------------------- pure-JAX reference ---------------------------------
def _leaky(x):
    return jnp.where(x >= 0, x, LEAKY_SLOPE * x)


def ref_forward(x_nchw, w1, b1, w2, b2, a_param, *, mxu_bf16=True):
    """Reference.  mxu_bf16=True mimics the kernel's precision choice
    (bf16 conv inputs/weights, f32 accumulation/elementwise)."""
    dn = ("NHWC", "HWIO", "NHWC")
    cast = ((lambda t: t.astype(jnp.bfloat16).astype(jnp.float32))
            if mxu_bf16 else (lambda t: t))
    x = jnp.transpose(x_nchw, (0, 2, 3, 1))

    def cbr(inp, w, b):
        y = jax.lax.conv_general_dilated(
            cast(inp), cast(w), (1, 1), ((PAD, PAD), (PAD, PAD)),
            dimension_numbers=dn, precision=jax.lax.Precision.HIGHEST)
        return _leaky(y + b)

    x1 = cbr(x, w1, b1)
    x2 = cbr(x1, w2, b2)
    a = jax.nn.sigmoid(a_param)[0]
    out = x1 * a + x2 * (a - 1.0)
    return jnp.transpose(out, (0, 3, 1, 2))


# ------------------------- deterministic parameter setup ----------------------
def fold_bn(w, b, gamma, beta, mean, var):
    scale = gamma / jnp.sqrt(var + BN_EPS)
    return w * scale, (b - mean) * scale + beta


def make_conv_bn_params(keys, cin, cout):
    w = jax.random.normal(keys[0], (K, K, cin, cout), jnp.float32) * 0.1
    b = jax.random.normal(keys[1], (cout,), jnp.float32) * 0.1
    gamma = jax.random.uniform(keys[2], (cout,), jnp.float32, 0.5, 1.5)
    beta = jax.random.normal(keys[3], (cout,), jnp.float32) * 0.1
    mean = jax.random.normal(keys[4], (cout,), jnp.float32) * 0.1
    var = jax.random.uniform(keys[5], (cout,), jnp.float32, 0.5, 1.5)
    return fold_bn(w, b, gamma, beta, mean, var)


if __name__ == "__main__":
    # cnn2Block requires in_ch == op_ch (cnn2 consumes cnn1's output) and
    # stride=1 / padding=1 so x1 and x2 shapes match for the blend.
    N, C, H, W = 2, 8, 16, 16
    Cout = C

    key = jax.random.PRNGKey(0)
    keys = jax.random.split(key, 13)

    x = jax.random.normal(keys[0], (N, C, H, W), jnp.float32)
    w1, b1 = make_conv_bn_params(keys[1:7], C, Cout)
    w2, b2 = make_conv_bn_params(keys[7:13], Cout, Cout)
    a_param = jnp.ones((1,), jnp.float32)          # tc.nn.Parameter(tc.ones(1))

    params = dict(a=a_param, w1=w1, b1=b1, w2=w2, b2=b2)

    out = jax.block_until_ready(cnn2block_forward(x, params))
    assert out.shape == (N, Cout, H, W), out.shape

    # Precision-matched check (kernel uses bf16 MXU inputs, f32 accumulation).
    ref_mp = ref_forward(x, w1, b1, w2, b2, a_param, mxu_bf16=True)
    err_mp = float(jnp.max(jnp.abs(out - ref_mp)))
    assert jnp.allclose(out, ref_mp, atol=5e-3, rtol=5e-3), f"bf16-matched err {err_mp}"

    # Loose sanity check against the full-f32 reference.
    ref_fp = ref_forward(x, w1, b1, w2, b2, a_param, mxu_bf16=False)
    err_fp = float(jnp.max(jnp.abs(out - ref_fp)))
    assert jnp.allclose(out, ref_fp, atol=1e-1, rtol=1e-1), f"f32 err {err_fp}"

    print("KERNEL_OK")
</pallas_src>

<mosaic_0001>
module attributes {stable_mosaic.version = 11 : i64} {
  func.func @_cnn2block_kernel(%arg0: i32, %arg1: memref<1xf32, #tpu.memory_space<smem>>, %arg2: memref<1x8x290xf32, #tpu.memory_space<vmem>>, %arg3: memref<8x72xbf16, #tpu.memory_space<vmem>>, %arg4: memref<8x1xf32, #tpu.memory_space<vmem>>, %arg5: memref<8x72xbf16, #tpu.memory_space<vmem>>, %arg6: memref<8x1xf32, #tpu.memory_space<vmem>>, %arg7: memref<1x256xf32, #tpu.memory_space<vmem>>, %arg8: memref<1x256xf32, #tpu.memory_space<vmem>>, %arg9: memref<1x8x256xf32, #tpu.memory_space<vmem>>, %arg10: memref<8x290xf32, #tpu.memory_space<vmem>>) attributes {dimension_semantics = [#tpu.dimension_semantics<parallel>], iteration_bounds = array<i64: 2>, scalar_prefetch = 0 : i64, scratch_operands = 1 : i64, tpu.core_type = #tpu.core_type<tc>, window_params = [{transform_indices = @transform_0, window_bounds = array<i64: 1>}, {transform_indices = @transform_1, window_bounds = array<i64: 1, 8, 290>}, {pipeline_mode = #tpu.pipeline_mode<synchronous>, transform_indices = @transform_2, window_bounds = array<i64: 8, 72>}, {pipeline_mode = #tpu.pipeline_mode<synchronous>, transform_indices = @transform_3, window_bounds = array<i64: 8, 1>}, {pipeline_mode = #tpu.pipeline_mode<synchronous>, transform_indices = @transform_4, window_bounds = array<i64: 8, 72>}, {pipeline_mode = #tpu.pipeline_mode<synchronous>, transform_indices = @transform_5, window_bounds = array<i64: 8, 1>}, {pipeline_mode = #tpu.pipeline_mode<synchronous>, transform_indices = @transform_6, window_bounds = array<i64: 1, 256>}, {pipeline_mode = #tpu.pipeline_mode<synchronous>, transform_indices = @transform_7, window_bounds = array<i64: 1, 256>}, {transform_indices = @transform_8, window_bounds = array<i64: 1, 8, 256>}]} {
    %c0 = arith.constant 0 : index
    %0 = memref.load %arg1[%c0] : memref<1xf32, #tpu.memory_space<smem>>
    %c0_0 = arith.constant 0 : index
    %c0_1 = arith.constant 0 : index
    %1 = vector.load %arg7[%c0_0, %c0_1] : memref<1x256xf32, #tpu.memory_space<vmem>>, vector<1x256xf32>
    %2 = vector.shape_cast %1 : vector<1x256xf32> to vector<1x256xf32>
    %3 = vector.broadcast %2 : vector<1x256xf32> to vector<8x256xf32>
    %c0_2 = arith.constant 0 : index
    %c0_3 = arith.constant 0 : index
    %4 = vector.load %arg8[%c0_2, %c0_3] : memref<1x256xf32, #tpu.memory_space<vmem>>, vector<1x256xf32>
    %5 = vector.shape_cast %4 : vector<1x256xf32> to vector<1x256xf32>
    %6 = vector.broadcast %5 : vector<1x256xf32> to vector<8x256xf32>
    %c0_4 = arith.constant 0 : index
    %c0_5 = arith.constant 0 : index
    %c0_6 = arith.constant 0 : index
    %7 = vector.load %arg2[%c0_4, %c0_5, %c0_6] : memref<1x8x290xf32, #tpu.memory_space<vmem>>, vector<1x8x256xf32>
    %8 = vector.shape_cast %7 : vector<1x8x256xf32> to vector<8x256xf32>
    %9 = arith.mulf %8, %3 : vector<8x256xf32>
    %c0_7 = arith.constant 0 : index
    %c0_8 = arith.constant 0 : index
    %c1 = arith.constant 1 : index
    %10 = vector.load %arg2[%c0_7, %c0_8, %c1] : memref<1x8x290xf32, #tpu.memory_space<vmem>>, vector<1x8x256xf32>
    %11 = vector.shape_cast %10 : vector<1x8x256xf32> to vector<8x256xf32>
    %c0_9 = arith.constant 0 : index
    %c0_10 = arith.constant 0 : index
    %c2 = arith.constant 2 : index
    %12 = vector.load %arg2[%c0_9, %c0_10, %c2] : memref<1x8x290xf32, #tpu.memory_space<vmem>>, vector<1x8x256xf32>
    %13 = vector.shape_cast %12 : vector<1x8x256xf32> to vector<8x256xf32>
    %14 = arith.mulf %13, %6 : vector<8x256xf32>
    %c0_11 = arith.constant 0 : index
    %c0_12 = arith.constant 0 : index
    %c16 = arith.constant 16 : index
    %15 = vector.load %arg2[%c0_11, %c0_12, %c16] : memref<1x8x290xf32, #tpu.memory_space<vmem>>, vector<1x8x256xf32>
    %16 = vector.shape_cast %15 : vector<1x8x256xf32> to vector<8x256xf32>
    %17 = arith.mulf %16, %3 : vector<8x256xf32>
    %c0_13 = arith.constant 0 : index
    %c0_14 = arith.constant 0 : index
    %c17 = arith.constant 17 : index
    %18 = vector.load %arg2[%c0_13, %c0_14, %c17] : memref<1x8x290xf32, #tpu.memory_space<vmem>>, vector<1x8x256xf32>
    %19 = vector.shape_cast %18 : vector<1x8x256xf32> to vector<8x256xf32>
    %c0_15 = arith.constant 0 : index
    %c0_16 = arith.constant 0 : index
    %c18 = arith.constant 18 : index
    %20 = vector.load %arg2[%c0_15, %c0_16, %c18] : memref<1x8x290xf32, #tpu.memory_space<vmem>>, vector<1x8x256xf32>
    %21 = vector.shape_cast %20 : vector<1x8x256xf32> to vector<8x256xf32>
    %22 = arith.mulf %21, %6 : vector<8x256xf32>
    %c0_17 = arith.constant 0 : index
    %c0_18 = arith.constant 0 : index
    %c32 = arith.constant 32 : index
    %23 = vector.load %arg2[%c0_17, %c0_18, %c32] : memref<1x8x290xf32, #tpu.memory_space<vmem>>, vector<1x8x256xf32>
    %24 = vector.shape_cast %23 : vector<1x8x256xf32> to vector<8x256xf32>
    %25 = arith.mulf %24, %3 : vector<8x256xf32>
    %c0_19 = arith.constant 0 : index
    %c0_20 = arith.constant 0 : index
    %c33 = arith.constant 33 : index
    %26 = vector.load %arg2[%c0_19, %c0_20, %c33] : memref<1x8x290xf32, #tpu.memory_space<vmem>>, vector<1x8x256xf32>
    %27 = vector.shape_cast %26 : vector<1x8x256xf32> to vector<8x256xf32>
    %c0_21 = arith.constant 0 : index
    %c0_22 = arith.constant 0 : index
    %c34 = arith.constant 34 : index
    %28 = vector.load %arg2[%c0_21, %c0_22, %c34] : memref<1x8x290xf32, #tpu.memory_space<vmem>>, vector<1x8x256xf32>
    %29 = vector.shape_cast %28 : vector<1x8x256xf32> to vector<8x256xf32>
    %30 = arith.mulf %29, %6 : vector<8x256xf32>
    %31 = tpu.concatenate %9, %11, %14, %17, %19, %22, %25, %27, %30 in 0 : vector<8x256xf32>, vector<8x256xf32>, vector<8x256xf32>, vector<8x256xf32>, vector<8x256xf32>, vector<8x256xf32>, vector<8x256xf32>, vector<8x256xf32>, vector<8x256xf32> -> vector<72x256xf32>
    %32 = arith.truncf %31 : vector<72x256xf32> to vector<72x256xbf16>
    %c0_23 = arith.constant 0 : index
    %c0_24 = arith.constant 0 : index
    %33 = vector.load %arg3[%c0_23, %c0_24] : memref<8x72xbf16, #tpu.memory_space<vmem>>, vector<8x72xbf16>
    %cst = arith.constant dense<0.000000e+00> : vector<8x256xf32>
    %34 = tpu.matmul %33, %32, %cst {dimension_numbers = #tpu.dot_dimension_numbers<[1], [0], [0], [1], [0, 0, 1, 1], [], []>} : vector<8x72xbf16>, vector<72x256xbf16>, vector<8x256xf32> -> vector<8x256xf32>
    %c0_25 = arith.constant 0 : index
    %c0_26 = arith.constant 0 : index
    %35 = vector.load %arg4[%c0_25, %c0_26] : memref<8x1xf32, #tpu.memory_space<vmem>>, vector<8x1xf32>
    %36 = vector.broadcast %35 : vector<8x1xf32> to vector<8x256xf32>
    %37 = arith.addf %34, %36 : vector<8x256xf32>
    %cst_27 = arith.constant 0.000000e+00 : f32
    %38 = vector.broadcast %cst_27 : f32 to vector<8x256xf32>
    %39 = arith.cmpf oge, %37, %38 : vector<8x256xf32>
    %cst_28 = arith.constant 9.99999974E-5 : f32
    %40 = vector.broadcast %cst_28 : f32 to vector<8x256xf32>
    %41 = arith.mulf %40, %37 : vector<8x256xf32>
    %42 = arith.select %39, %37, %41 : vector<8x256xi1>, vector<8x256xf32>
    %cst_29 = arith.constant 0.000000e+00 : f32
    %43 = vector.broadcast %cst_29 : f32 to vector<8x17xf32>
    %c0_30 = arith.constant 0 : index
    %c0_31 = arith.constant 0 : index
    %44 = vector.load %arg10[%c0_30, %c0_31] : memref<8x290xf32, #tpu.memory_space<vmem>>, vector<8x17xf32>
    tpu.vector_store %arg10[%c0_30, %c0_31], %43 {strides = array<i32>} : memref<8x290xf32, #tpu.memory_space<vmem>>, vector<8x17xf32>,
    %cst_32 = arith.constant 0.000000e+00 : f32
    %45 = vector.broadcast %cst_32 : f32 to vector<8x17xf32>
    %c0_33 = arith.constant 0 : index
    %c273 = arith.constant 273 : index
    %46 = vector.load %arg10[%c0_33, %c273] : memref<8x290xf32, #tpu.memory_space<vmem>>, vector<8x17xf32>
    tpu.vector_store %arg10[%c0_33, %c273], %45 {strides = array<i32>} : memref<8x290xf32, #tpu.memory_space<vmem>>, vector<8x17xf32>,
    %c0_34 = arith.constant 0 : index
    %c17_35 = arith.constant 17 : index
    %47 = vector.load %arg10[%c0_34, %c17_35] : memref<8x290xf32, #tpu.memory_space<vmem>>, vector<8x256xf32>
    tpu.vector_store %arg10[%c0_34, %c17_35], %42 {strides = array<i32>} : memref<8x290xf32, #tpu.memory_space<vmem>>, vector<8x256xf32>,
    %c0_36 = arith.constant 0 : index
    %c0_37 = arith.constant 0 : index
    %48 = vector.load %arg10[%c0_36, %c0_37] : memref<8x290xf32, #tpu.memory_space<vmem>>, vector<8x256xf32>
    %49 = arith.mulf %48, %3 : vector<8x256xf32>
    %c0_38 = arith.constant 0 : index
    %c1_39 = arith.constant 1 : index
    %50 = vector.load %arg10[%c0_38, %c1_39] : memref<8x290xf32, #tpu.memory_space<vmem>>, vector<8x256xf32>
    %c0_40 = arith.constant 0 : index
    %c2_41 = arith.constant 2 : index
    %51 = vector.load %arg10[%c0_40, %c2_41] : memref<8x290xf32, #tpu.memory_space<vmem>>, vector<8x256xf32>
    %52 = arith.mulf %51, %6 : vector<8x256xf32>
    %c0_42 = arith.constant 0 : index
    %c16_43 = arith.constant 16 : index
    %53 = vector.load %arg10[%c0_42, %c16_43] : memref<8x290xf32, #tpu.memory_space<vmem>>, vector<8x256xf32>
    %54 = arith.mulf %53, %3 : vector<8x256xf32>
    %c0_44 = arith.constant 0 : index
    %c17_45 = arith.constant 17 : index
    %55 = vector.load %arg10[%c0_44, %c17_45] : memref<8x290xf32, #tpu.memory_space<vmem>>, vector<8x256xf32>
    %c0_46 = arith.constant 0 : index
    %c18_47 = arith.constant 18 : index
    %56 = vector.load %arg10[%c0_46, %c18_47] : memref<8x290xf32, #tpu.memory_space<vmem>>, vector<8x256xf32>
    %57 = arith.mulf %56, %6 : vector<8x256xf32>
    %c0_48 = arith.constant 0 : index
    %c32_49 = arith.constant 32 : index
    %58 = vector.load %arg10[%c0_48, %c32_49] : memref<8x290xf32, #tpu.memory_space<vmem>>, vector<8x256xf32>
    %59 = arith.mulf %58, %3 : vector<8x256xf32>
    %c0_50 = arith.constant 0 : index
    %c33_51 = arith.constant 33 : index
    %60 = vector.load %arg10[%c0_50, %c33_51] : memref<8x290xf32, #tpu.memory_space<vmem>>, vector<8x256xf32>
    %c0_52 = arith.constant 0 : index
    %c34_53 = arith.constant 34 : index
    %61 = vector.load %arg10[%c0_52, %c34_53] : memref<8x290xf32, #tpu.memory_space<vmem>>, vector<8x256xf32>
    %62 = arith.mulf %61, %6 : vector<8x256xf32>
    %63 = tpu.concatenate %49, %50, %52, %54, %55, %57, %59, %60, %62 in 0 : vector<8x256xf32>, vector<8x256xf32>, vector<8x256xf32>, vector<8x256xf32>, vector<8x256xf32>, vector<8x256xf32>, vector<8x256xf32>, vector<8x256xf32>, vector<8x256xf32> -> vector<72x256xf32>
    %64 = arith.truncf %63 : vector<72x256xf32> to vector<72x256xbf16>
    %c0_54 = arith.constant 0 : index
    %c0_55 = arith.constant 0 : index
    %65 = vector.load %arg5[%c0_54, %c0_55] : memref<8x72xbf16, #tpu.memory_space<vmem>>, vector<8x72xbf16>
    %cst_56 = arith.constant dense<0.000000e+00> : vector<8x256xf32>
    %66 = tpu.matmul %65, %64, %cst_56 {dimension_numbers = #tpu.dot_dimension_numbers<[1], [0], [0], [1], [0, 0, 1, 1], [], []>} : vector<8x72xbf16>, vector<72x256xbf16>, vector<8x256xf32> -> vector<8x256xf32>
    %c0_57 = arith.constant 0 : index
    %c0_58 = arith.constant 0 : index
    %67 = vector.load %arg6[%c0_57, %c0_58] : memref<8x1xf32, #tpu.memory_space<vmem>>, vector<8x1xf32>
    %68 = vector.broadcast %67 : vector<8x1xf32> to vector<8x256xf32>
    %69 = arith.addf %66, %68 : vector<8x256xf32>
    %cst_59 = arith.constant 0.000000e+00 : f32
    %70 = vector.broadcast %cst_59 : f32 to vector<8x256xf32>
    %71 = arith.cmpf oge, %69, %70 : vector<8x256xf32>
    %cst_60 = arith.constant 9.99999974E-5 : f32
    %72 = vector.broadcast %cst_60 : f32 to vector<8x256xf32>
    %73 = arith.mulf %72, %69 : vector<8x256xf32>
    %74 = arith.select %71, %69, %73 : vector<8x256xi1>, vector<8x256xf32>
    %75 = vector.broadcast %0 : f32 to vector<8x256xf32>
    %76 = arith.mulf %42, %75 : vector<8x256xf32>
    %cst_61 = arith.constant 1.000000e+00 : f32
    %77 = arith.subf %0, %cst_61 : f32
    %78 = vector.broadcast %77 : f32 to vector<8x256xf32>
    %79 = arith.mulf %74, %78 : vector<8x256xf32>
    %80 = arith.addf %76, %79 : vector<8x256xf32>
    %c0_62 = arith.constant 0 : index
    %c0_63 = arith.constant 0 : index
    %c0_64 = arith.constant 0 : index
    %81 = vector.load %arg9[%c0_62, %c0_63, %c0_64] : memref<1x8x256xf32, #tpu.memory_space<vmem>>, vector<1x8x256xf32>
    %82 = vector.shape_cast %81 : vector<1x8x256xf32> to vector<8x256xf32>
    %83 = vector.shape_cast %80 : vector<8x256xf32> to vector<1x8x256xf32>
    tpu.vector_store %arg9[%c0_62, %c0_63, %c0_64], %83 {strides = array<i32>} : memref<1x8x256xf32, #tpu.memory_space<vmem>>, vector<1x8x256xf32>,
    return
  }
  func.func @transform_0(%arg0: i32) -> i32 {
    %c0_i32 = arith.constant 0 : i32
    %c0_i32_0 = arith.constant 0 : i32
    return %c0_i32 : i32
  }
  func.func @transform_1(%arg0: i32) -> (i32, i32, i32) {
    %c0_i32 = arith.constant 0 : i32
    %c0_i32_0 = arith.constant 0 : i32
    %c0_i32_1 = arith.constant 0 : i32
    return %arg0, %c0_i32, %c0_i32_0 : i32, i32, i32
  }
  func.func @transform_2(%arg0: i32) -> (i32, i32) {
    %c0_i32 = arith.constant 0 : i32
    %c0_i32_0 = arith.constant 0 : i32
    %c0_i32_1 = arith.constant 0 : i32
    return %c0_i32, %c0_i32_0 : i32, i32
  }
  func.func @transform_3(%arg0: i32) -> (i32, i32) {
    %c0_i32 = arith.constant 0 : i32
    %c0_i32_0 = arith.constant 0 : i32
    %c0_i32_1 = arith.constant 0 : i32
    return %c0_i32, %c0_i32_0 : i32, i32
  }
  func.func @transform_4(%arg0: i32) -> (i32, i32) {
    %c0_i32 = arith.constant 0 : i32
    %c0_i32_0 = arith.constant 0 : i32
    %c0_i32_1 = arith.constant 0 : i32
    return %c0_i32, %c0_i32_0 : i32, i32
  }
  func.func @transform_5(%arg0: i32) -> (i32, i32) {
    %c0_i32 = arith.constant 0 : i32
    %c0_i32_0 = arith.constant 0 : i32
    %c0_i32_1 = arith.constant 0 : i32
    return %c0_i32, %c0_i32_0 : i32, i32
  }
  func.func @transform_6(%arg0: i32) -> (i32, i32) {
    %c0_i32 = arith.constant 0 : i32
    %c0_i32_0 = arith.constant 0 : i32
    %c0_i32_1 = arith.constant 0 : i32
    return %c0_i32, %c0_i32_0 : i32, i32
  }
  func.func @transform_7(%arg0: i32) -> (i32, i32) {
    %c0_i32 = arith.constant 0 : i32
    %c0_i32_0 = arith.constant 0 : i32
    %c0_i32_1 = arith.constant 0 : i32
    return %c0_i32, %c0_i32_0 : i32, i32
  }
  func.func @transform_8(%arg0: i32) -> (i32, i32, i32) {
    %c0_i32 = arith.constant 0 : i32
    %c0_i32_0 = arith.constant 0 : i32
    %c0_i32_1 = arith.constant 0 : i32
    return %arg0, %c0_i32, %c0_i32_0 : i32, i32, i32
  }
}

</mosaic_0001>

<bundles_post_ra>
// kernel: tpu_custom_call.1
= control target key start
LH: loop header
LB: loop body
LE: loop exit
PB: predicated region body
PF: predicated region fallthrough
CT: control target
= control target key end

     0   :  { %s1582_s0 = inlined_call_operand.<no memory space> [shape: f32[1], index: 0, kind: input, shape index: {}]   ;;  %s1583_s1 = inlined_call_operand.hbm [shape: f32[2,8,290], index: 1, kind: input, shape index: {}]   ;;  %s1584_s2 = inlined_call_operand.vmem [shape: bf16[8,72], index: 2, kind: input, shape index: {}]   ;;  %s1585_s3 = inlined_call_operand.vmem [shape: f32[8,1], index: 3, kind: input, shape index: {}]   ;;  %s1586_s4 = inlined_call_operand.vmem [shape: bf16[8,72], index: 4, kind: input, shape index: {}]   ;;  %s1587_s5 = inlined_call_operand.vmem [shape: f32[8,1], index: 5, kind: input, shape index: {}]   ;;  %s1588_s6 = inlined_call_operand.vmem [shape: f32[1,256], index: 6, kind: input, shape index: {}]   ;;  %s1589_s7 = inlined_call_operand.vmem [shape: f32[1,256], index: 7, kind: input, shape index: {}]   ;;  %s1590_s8 = inlined_call_operand.hbm [shape: f32[2,8,256], index: 8, kind: output, shape index: {}]  }
   0x1   :  { %13 = sst [smem:[#allocation3]] %s1582_s0 }
   0x2   :  { %14 = vsyncpa [#allocation5], 0 }
   0x3   :  { %16 = vsyncpa [#allocation5 + $0x1], 0 }
   0x4   :  { %17 = vsyncpa [#allocation6], 0 }
   0x5   :  { %19 = vsyncpa [#allocation6 + $0x1], 0  ;;  %s1221_s29 = smov 0   ;;  %s1223_s30 = smov 0  }
   0x6   :  { %s1225_s9 = smov 0   ;;  %s1227_s10 = smov 0  }
   0x7 LB: > { %s1242_s0 = sadd.s32 4294967295, %s1153_s10   ;;  %s898_s11 = sadd.s32 4294967294, %s1153_s10   ;;  %s1153_s10 = sphi %s1227_s10, %s1608_s10   ;;  %s1149_s9 = sphi %s1225_s9, %s1607_s9   ;;  %s1145_s30 = sphi %s1223_s30, %s1606_s30   ;;  %s1141_s29 = sphi %s1221_s29, %s1605_s29  }
   0x8   : > { %s1246_s12 = sadd.s32 1, %s1153_s10   ;;  %s53_s13 = sadd.s32 1, %s1149_s9 }
   0x9   : > { %s50_s14 = ssub.s32 %s1153_s10, %s1246_s12  ;;  %p60_p0 = scmp.ne.s32.totalorder %s1149_s9, %s1145_s30 }
   0xa   : > { %p51_p1 = scmp.eq.s32.totalorder %s50_s14, 0  ;;  %p61_p2 = scmp.eq.s32.totalorder %s1153_s10, 0 }
   0xb   : > { %p66_p3 = scmp.ne.s32.totalorder %s1145_s30, %s1141_s29  ;;  %p67_p4 = scmp.eq.s32.totalorder %s1242_s0, 0 }
   0xc   : > { %s1258_s15 = scalar_select %p51_p1, %s1149_s9, %s53_s13  }
   0xd   : > { %p62_p5 = por %p61_p2, %p60_p0  ;;  %p1260_p6 = por %p67_p4, %p66_p3 }
   0xe   : > { %1593 = sst [smem:[#allocation10_spill]] %s1258_s15  ;;  %p216_p7 = scmp.eq.s32.totalorder %s1242_s0, 1 }
   0xf   : > { %s1594_s16 = scalar_select %p1260_p6, 1, 0 }
  0x10   : > { %p222_p8 = scmp.eq.s32.totalorder %s898_s11, 1  ;;  %p930_p10 = scmp.lt.s32.totalorder %s1153_s10, 2 }
  0x11   : > { %p1267_p11 = por %p216_p7, %p60_p0  ;;  %s263_s19 = sand.u32 1, %s1149_s9  }
  0x12   : > { %p1271_p12 = por %p222_p8, %p66_p3  ;;  %s916_s20 = smul.u32 384, %s1153_s10 }
  0x13   : > { %s1595_s17 = scalar_select %p1267_p11, 1, 0 }
  0x14   : > { %s1596_s18 = scalar_select %p1271_p12, 1, 0 }
  0x15   : > { %s915_s21 = smul.u32 24, %s263_s19  ;;  %s1280_s24 = scalar_lea.hbm %s1583_s1, %s916_s20 }
  0x16   : > { %p1282_p13 = pnand %p930_p10, %p62_p5  ;;  %s264_s28 = scalar_lea.sflag [#allocation5], %s263_s19 }
  0x17   : > { %s267_s26 = scalar_lea.vmem [#allocation4], %s915_s21  ;;  %s1061_s11 = scalar_lea.hbm %s1280_s24, 384 }
  0x18   : > { %s275_s27 = sshll.u32 %s267_s26, 4  ;;  %p1062_p2 = scmp.ne.s32.totalorder %s1280_s24, %s1061_s11  ;;  %s276_s27 = int_to_ptr.vmem [resolvable:$true] %s275_s27 }
  0x19   : > { %p1063_p3 = pneg %p1282_p13  ;;  %s1066_s20 = scalar_lea.hbm %s1583_s1, 768 }
  0x1a   : > { %p1067_p5 = scmp.lt.s32.totalorder %s1280_s24, %s1583_s1  ;;  %p1068_p8 = scmp.lt.s32.totalorder %s1066_s20, %s1061_s11 }
  0x1b   : > { %p1064_p4 = pnand %p1063_p3, %p1062_p2 }
  0x1c   : > { %p1069_p10 = por %p1068_p8, %p1067_p5 }
  0x1d   : > { %p1065_p7 = pneg %p1064_p4 }
  0x1f   : > { %p1070_p9 = pnand %p1069_p10, %p1065_p7 }
  0x21   : > { %1073 = shalt.err (!%p1070_p9)
}
  0x22   : > { %s1074_s21 = scalar_lea.vmem %s276_s27, 384  ;;  %s1155_s19 = smov [#allocation4]  }
  0x23   : > { %p1075_p0 = scmp.ne.s32.totalorder %s276_s27, %s1074_s21  ;;  %s1079_s26 = sshll.u32 %s1155_s19, 4  ;;  %s1080_s26 = int_to_ptr.vmem [resolvable:$false] %s1079_s26 }
  0x24   : > { %s1081_s15 = scalar_lea.vmem %s1080_s26, 768  ;;  %p1082_p2 = scmp.lt.s32.totalorder %s276_s27, %s1080_s26 }
  0x25   : > { %p1077_p1 = pnand %p1075_p0, %p1063_p3  ;;  %p1083_p4 = scmp.lt.s32.totalorder %s1081_s15, %s1074_s21 }
  0x27   : > { %p1078_p12 = pneg %p1077_p1  ;;  %p1084_p11 = por %p1083_p4, %p1082_p2 }
  0x29   : > { %p1085_p6 = pnand %p1084_p11, %p1078_p12 }
  0x2b   : > { %1088 = shalt.err (!%p1085_p6)
}
  0x2c   : > { %925 = dma.hbm_to_vmem [thread:$0]  (!%p1282_p13), %s1280_s24, 384, %s276_s27, %s264_s28  }
  0x2d   : > { %p1598_p9 = scmp.lt.s32.totalorder %s1153_s10, 3  ;;  %p1599_p7 = scmp.ge.s32.totalorder %s1153_s10, 1 }
  0x2f   : > { %p281_p5 = pnand %p1599_p7, %p1598_p9 }
  0x30   : > { %s1307_s11 = sand.u32 (!%p281_p5), 1, %s1145_s30   ;;  %p1600_p6 = scmp.ne.s32.totalorder (!%p281_p5), %s1594_s16, 0 }
  0x31   : > { %284 = sbr.rel (%p281_p5) target bundleno = 1018 (0x3fa), region = 52  ;;  %s287_s13 = scalar_lea.sflag (!%p281_p5), [#allocation5], %s1307_s11 }
  0x32   : > { %s917_s15 = smul.u32 (!%p281_p5), 24, %s1307_s11 }
  0x34   : > { %s1311_s14 = scalar_lea.vmem (!%p281_p5), [#allocation4], %s917_s15 }
  0x36   : > { %1132 = dma.done.wait (%p1600_p6), %s287_s13, 384  }
  0x37   : > { %1134 = vsyncadd (%p1600_p6), %s287_s13, 4294966912  ;;  %v327_v0 = vlaneseq  ;;  %v337_v4 = vld [vmem:[%s1589_s7] sm:$0x3]  ;;  %s1156_s20 = smov 34   ;;  %s1157_s16 = smov 32   ;;  %v1343_v13 = vld [vmem:[%s1311_s14] sm:$0xff] }
  0x38   : > { %v325_v5 = vld [vmem:[%s1588_s6] sm:$0x3]  ;;  %s1158_s22 = smov 18   ;;  %s1159_s23 = smov 2   ;;  %vm404_vm0 = vcmask 277504   ;;  %vm392_vm1 = vcmask 261120  }
  0x39   : > { %v328_v1 = vshrl.u32 %v327_v0, 7  ;;  %v1330_v10 = vld [vmem:[%s1311_s14 + $0x8] sm:$0xff]  ;;  %v351_v11 = vld [vmem:[%s1311_s14 + $0x10] sm:$0xff]  ;;  %s1160_s21 = smov 16   ;;  %s1161_s19 = smov 111   ;;  %vm380_vm2 = vcmask 146432  }
  0x3a   : > { %v1336_v12 = vpack.i.bf16 %v351_v11, %v1330_v10  ;;  %s1162_s26 = smov 95   ;;  %s1163_s15 = smov 96   ;;  %vm356_vm3 = vcmask 15360   ;;  %vm368_vm4 = vcmask 130048   ;;  %v1167_v48 = vmov 0   ;;  %v529_v50 = vld [vmem:[%s1585_s3] sm:$0xff] }
  0x3b   : > { %v329_v2 = vsub.s32 0, %v328_v1  ;;  %v333_v3 = vsub.s32 1, %v328_v1  ;;  %s1164_s13 = smov 94   ;;  %s1165_s14 = smov 110   ;;  %578 = vmatprep.mubr.bf16.mxu0 %v1167_v48  ;;  %1020 = vset.pattern.permute.xlu0 %v1167_v48  ;;  %vm513_vm5 = vcmask 769024   ;;  %vm499_vm6 = vcmask 777216  }
  0x3c   : > { %s1166_s24 = smov 126   ;;  %s1168_s25 = smov 112   ;;  %787 = vmatprep.mubr.bf16.mxu1 %v1167_v48  ;;  %vm539_vm7 = vcmask 1043456   ;;  %vm488_vm8 = vcmask 785408   ;;  %vm460_vm9 = vcmask 908288   ;;  %vm474_vm10 = vcmask 900096  }
  0x3d   : > { %v342_v6 = vrot.slane %v337_v4, %v329_v2  ;;  %v1323_v7 = vrot.slane %v325_v5, %v329_v2  ;;  %v346_v8 = vrot.slane %v337_v4, %v333_v3  ;;  %v1326_v9 = vrot.slane %v325_v5, %v333_v3  ;;  %s1169_s27 = smov 127   ;;  %p1601_p12 = scmp.ne.s32.totalorder %s1595_s17, 0 }
  0x3e   : > { %vm435_vm11 = vcmask 1031168   ;;  %vm449_vm12 = vcmask 916480   ;;  %vm421_vm13 = vcmask 1039360   ;;  %vm535_vm14 = vcmask 588800  }
  0x3f   : > { %400 = vrot.lane.b32.xlu0 %v342_v6, %s1156_s20  ;;  %388 = vrot.lane.b32.xlu1 %v1323_v7, %s1157_s16  ;;  %vm593_vm15 = vcmask 138240  }
  0x43   : > { %402 = vrot.lane.b32.xlu0 %v346_v8, %s1156_s20  ;;  %390 = vrot.lane.b32.xlu1 %v1326_v9, %s1157_s16 }
  0x47   : > { %376 = vrot.lane.b32.xlu0 %v342_v6, %s1158_s22  ;;  %378 = vrot.lane.b32.xlu1 %v346_v8, %s1158_s22 }
  0x4b   : > { %352 = vrot.lane.b32.xlu0 %v342_v6, %s1159_s23  ;;  %354 = vrot.lane.b32.xlu1 %v346_v8, %s1159_s23  ;;  %s1171_s23 = smov 17  }
  0x4f   : > { %364 = vrot.lane.b32.xlu0 %v1323_v7, %s1160_s21  ;;  %366 = vrot.lane.b32.xlu1 %v1326_v9, %s1160_s21 }
  0x53   : > { %986 = vrot.lane.b32.xlu0 %v1336_v12, %s1161_s19  ;;  %981 = vrot.lane.b32.xlu1 %v1336_v12, %s1162_s26 }
  0x57   : > { %454 = vrot.lane.b32.xlu0 %v1343_v13, %s1161_s19  ;;  %493 = vrot.lane.b32.xlu1 %v1343_v13, %s1162_s26 }
  0xb1   : > { %v1349_v14 = vpop.permute.xlu0 %400  ;;  %v1351_v15 = vpop.permute.xlu1 %388 }
  0xb2   : > { %v397_v16 = vmul.f32 %v1351_v15, %v1343_v13  ;;  %v409_v22 = vmul.f32 %v1349_v14, %v1343_v13 }
  0xb4   : > { %482 = vrot.lane.b32.xlu0 %v397_v16, %s1163_s15 }
  0xb5   : > { %v1356_v17 = vpop.permute.xlu0 %402  ;;  %v1358_v18 = vpop.permute.xlu1 %390 }
  0xb6   : > { %v1362_v19 = vsel %vm404_vm0, %v1349_v14, %v1356_v17  ;;  %v411_v20 = vmul.f32 %v1356_v17, %v351_v11  ;;  %v1367_v21 = vsel %vm392_vm1, %v1351_v15, %v1358_v18  ;;  %v399_v25 = vmul.f32 %v1358_v18, %v351_v11 }
  0xb7   : > { %v410_v23 = vmul.f32 %v1362_v19, %v1330_v10  ;;  %v398_v24 = vmul.f32 %v1367_v21, %v1330_v10  ;;  %vm595_vm0 = vcmask 277640  }
  0xb8   : > { %511 = vrot.lane.b32.xlu1 %v411_v20, %s1164_s13 }
  0xb9   : > { %v1377_v26 = vpop.permute.xlu0 %376  ;;  %v1379_v27 = vpop.permute.xlu1 %378  ;;  %v990_v28 = vpack.i.bf16 %v410_v23, %v409_v22  ;;  %v995_v35 = vpack.i.bf16 %v399_v25, %v398_v24 }
  0xba   : > { %v385_v29 = vmul.f32 %v1377_v26, %v1343_v13  ;;  %v1385_v30 = vsel %vm380_vm2, %v1377_v26, %v1379_v27  ;;  %v387_v31 = vmul.f32 %v1379_v27, %v351_v11 }
  0xbb   : > { %v386_v32 = vmul.f32 %v1385_v30, %v1330_v10  ;;  %991 = vrot.lane.b32.xlu0 %v990_v28, %s1164_s13 }
  0xbc   : > { %468 = vrot.lane.b32.xlu1 %v385_v29, %s1165_s14 }
  0xbd   : > { %v1392_v33 = vpop.permute.xlu0 %352  ;;  %v1394_v34 = vpop.permute.xlu1 %354  ;;  %v1000_v36 = vpack.i.bf16 %v387_v31, %v386_v32 }
  0xbe   : > { %v1398_v37 = vsel %vm356_vm3, %v1392_v33, %v1394_v34  ;;  %v361_v38 = vmul.f32 %v1392_v33, %v1343_v13  ;;  %v363_v40 = vmul.f32 %v1394_v34, %v351_v11  ;;  %vm607_vm3 = vcmask 1047688  }
  0xbf   : > { %996 = vrot.lane.b32.xlu0 %v995_v35, %s1163_s15  ;;  %v362_v39 = vmul.f32 %v1398_v37, %v1330_v10 }
  0xc0   : > { %1001 = vrot.lane.b32.xlu1 %v1000_v36, %s1165_s14 }
  0xc1   : > { %v1407_v41 = vpop.permute.xlu0 %364  ;;  %v1409_v42 = vpop.permute.xlu1 %366  ;;  %v1005_v46 = vpack.i.bf16 %v363_v40, %v362_v39 }
  0xc2   : > { %v1413_v43 = vsel %vm368_vm4, %v1407_v41, %v1409_v42  ;;  %v375_v44 = vmul.f32 %v1409_v42, %v351_v11  ;;  %v373_v49 = vmul.f32 %v1407_v41, %v1343_v13 }
  0xc3   : > { %v374_v45 = vmul.f32 %v1413_v43, %v1330_v10  ;;  %429 = vrot.lane.b32.xlu0 %v361_v38, %s1166_s24 }
  0xc5   : > { %v1010_v47 = vpack.i.bf16 %v375_v44, %v374_v45  ;;  %v987_v51 = vpop.permute.xlu0 %986  ;;  %v982_v52 = vpop.permute.xlu1 %981 }
  0xc6   : > { %v984_v61 = vunpack.i.h.bf16 %v982_v52  ;;  %v983_v62 = vunpack.i.l.bf16 %v982_v52  ;;  %v989_v1 = vunpack.i.h.bf16 %v987_v51  ;;  %v988_v2 = vunpack.i.l.bf16 %v987_v51 }
  0xc7   : > { %1006 = vrot.lane.b32.xlu0 %v1005_v46, %s1166_s24  ;;  %1011 = vrot.lane.b32.xlu1 %v1010_v47, %s1168_s25 }
  0xc8   : > { %v501_v24 = vsel %vm499_vm6, %v983_v62, %v984_v61  ;;  %v462_v32 = vsel %vm460_vm9, %v988_v2, %v989_v1  ;;  %v349_v61 = vmul.f32 %v1343_v13, %v1323_v7 }
  0xc9   : > { %v455_v53 = vpop.permute.xlu0 %454  ;;  %v494_v54 = vpop.permute.xlu1 %493 }
  0xca   : > { %v500_v22 = vsel %vm499_vm6, %v494_v54, %v983_v62  ;;  %v461_v39 = vsel %vm460_vm9, %v455_v53, %v988_v2  ;;  %v350_v53 = vmul.f32 %v1330_v10, %v1326_v9  ;;  %v528_v10 = vld [vmem:[%s1584_s2] sm:$0xf] }
  0xcb   : > { %443 = vrot.lane.b32.xlu1 %v373_v49, %s1168_s25  ;;  %1016 = vrot.lane.b32.xlu0 %v1336_v12, %s1169_s27 }
  0xcf   : > { %415 = vrot.lane.b32.xlu1 %v1343_v13, %s1169_s27  ;;  %532 = vperm.xlu0 %1020, %v529_v50  }
 0x126   : > { %v483_v55 = vpop.permute.xlu0 %482 }
 0x12a   : > { %v512_v56 = vpop.permute.xlu1 %511 }
 0x12d   : > { %v992_v57 = vpop.permute.xlu0 %991 }
 0x12e   : > { %v994_v58 = vunpack.i.h.bf16 %v992_v57  ;;  %v993_v59 = vunpack.i.l.bf16 %v992_v57  ;;  %v469_v60 = vpop.permute.xlu1 %468 }
 0x130   : > { %v515_v63 = vsel %vm513_vm5, %v994_v58, %v512_v56  ;;  %v514_v0 = vsel %vm513_vm5, %v993_v59, %v994_v58 }
 0x131   : > { %v997_v3 = vpop.permute.xlu0 %996  ;;  %v527_v4 = vpack.c.bf16 %v515_v63, %v515_v63  ;;  %v526_v5 = vpack.c.bf16 %v514_v0, %v514_v0 }
 0x132   : > { %v999_v6 = vunpack.i.h.bf16 %v997_v3  ;;  %v998_v8 = vunpack.i.l.bf16 %v997_v3  ;;  %v1002_v11 = vpop.permute.xlu1 %1001  ;;  %v1170_v3 = vmov 0.0  }
 0x133   : > { %v1004_v12 = vunpack.i.h.bf16 %v1002_v11  ;;  %v1003_v16 = vunpack.i.l.bf16 %v1002_v11  ;;  %904 = vmatprep.subr.msk.bf16.mxu0 %vm539_vm7, %v527_v4  ;;  %v541_v20 = vsel %vm539_vm7, %v526_v5, 0  ;;  %594 = vst.msk [vmem:[#allocation2] sm:$0xff] %vm593_vm15, %v1170_v3 }
 0x134   : > { %553 = vmatpush1.bf16.msra.mxu0 %v541_v20  ;;  %v490_v23 = vsel %vm488_vm8, %v998_v8, %v999_v6  ;;  %v489_v25 = vsel %vm488_vm8, %v483_v55, %v998_v8  ;;  %596 = vst.msk [vmem:[#allocation2 + $0x10] sm:$0xff] %vm595_vm0, %v1170_v3 }
 0x135   : > { %v430_v28 = vpop.permute.xlu0 %429  ;;  %v525_v29 = vpack.c.bf16 %v501_v24, %v490_v23  ;;  %v524_v31 = vpack.c.bf16 %v500_v22, %v489_v25  ;;  %v476_v35 = vsel %vm474_vm10, %v1003_v16, %v1004_v12  ;;  %v475_v38 = vsel %vm474_vm10, %v469_v60, %v1003_v16 }
 0x136   : > { %v523_v36 = vpack.c.bf16 %v476_v35, %v462_v32  ;;  %v522_v45 = vpack.c.bf16 %v475_v38, %v461_v39 }
 0x137   : > { %554 = vmatprep.subr.bf16.mxu0 %v525_v29 }
 0x138   : > { %555 = vmatpush1.bf16.msra.mxu0 %v524_v31 }
 0x139   : > { %v1007_v40 = vpop.permute.xlu0 %1006  ;;  %v1012_v44 = vpop.permute.xlu1 %1011  ;;  %556 = vmatprep.subr.bf16.mxu0 %v523_v36 }
 0x13a   : > { %v1009_v46 = vunpack.i.h.bf16 %v1007_v40  ;;  %v1008_v47 = vunpack.i.l.bf16 %v1007_v40  ;;  %v1014_v48 = vunpack.i.h.bf16 %v1012_v44  ;;  %v1013_v49 = vunpack.i.l.bf16 %v1012_v44 }
 0x13c   : > { %557 = vmatpush1.bf16.msra.mxu0 %v522_v45  ;;  %v437_v50 = vsel %vm435_vm11, %v1008_v47, %v1009_v46  ;;  %v451_v51 = vsel %vm449_vm12, %v1013_v49, %v1014_v48  ;;  %v436_v56 = vsel %vm435_vm11, %v430_v28, %v1008_v47 }
 0x13d   : > { %v444_v52 = vpop.permute.xlu1 %443  ;;  %v1017_v54 = vpop.permute.xlu0 %1016  ;;  %v521_v55 = vpack.c.bf16 %v451_v51, %v437_v50 }
 0x13e   : > { %v450_v57 = vsel %vm449_vm12, %v444_v52, %v1013_v49  ;;  %v1019_v58 = vunpack.i.h.bf16 %v1017_v54  ;;  %v1018_v59 = vunpack.i.l.bf16 %v1017_v54 }
 0x13f   : > { %v520_v60 = vpack.c.bf16 %v450_v57, %v436_v56  ;;  %558 = vmatprep.subr.bf16.mxu0 %v521_v55 }
 0x140   : > { %v423_v62 = vsel %vm421_vm13, %v1018_v59, %v1019_v58 }
 0x141   : > { %v416_v63 = vpop.permute.xlu1 %415  ;;  %559 = vmatpush1.bf16.msra.mxu0 %v520_v60  ;;  %v519_v0 = vpack.c.bf16 %v423_v62, %v350_v53 }
 0x142   : > { %v422_v1 = vsel %vm421_vm13, %v416_v63, %v1018_v59 }
 0x143   : > { %v518_v2 = vpack.c.bf16 %v422_v1, %v349_v61  ;;  %560 = vmatprep.subr.bf16.mxu0 %v519_v0 }
 0x145   : > { %561 = vmatpush1.bf16.msra.mxu0 %v518_v2 }
 0x148   : > { %905 = vmatmul.mubr.msk.bf16.vlgmr.msra.gmra.mxu0 %vm535_vm14, %v528_v10 }
 0x14a   : > { %v533_v13 = vpop.permute.xlu0 %532 }
 0x208   : > { %v580_v4 = vpop.f32.mrf.mxu0 }
 0x209   : > { %v581_v5 = vadd.f32 %v580_v4, %v533_v13 }
 0x20a   : > { %v582_v6 = vpop.f32.mrf.mxu0 }
 0x20b   : > { %v589_v8 = vmul.f32 0.0001, %v581_v5  ;;  %v583_v11 = vadd.f32 %v582_v6, %v533_v13  ;;  %vm587_vm1 = vcmp.ge.f32.partialorder %v581_v5, 0.0 }
 0x20c   : > { %v584_v12 = vpop.f32.mrf.mxu0 }
 0x20d   : > { %v590_v16 = vmul.f32 0.0001, %v583_v11  ;;  %v1458_v20 = vsel %vm587_vm1, %v581_v5, %v589_v8  ;;  %vm588_vm2 = vcmp.ge.f32.partialorder %v583_v11, 0.0 }
 0x20e   : > { %v585_v22 = vpop.f32.mrf.mxu0  ;;  %599 = vrot.lane.b32.xlu1 %v1458_v20, %s1171_s23 }
 0x20f   : > { %v1461_v23 = vsel %vm588_vm2, %v583_v11, %v590_v16 }
 0x212   : > { %601 = vrot.lane.b32.xlu1 %v1461_v23, %s1171_s23  ;;  %s814_s23 = scalar_lea.sflag [#allocation6], %s1307_s11 }
 0x280   : > { %v600_v24 = vpop.permute.xlu1 %599 }
 0x281   : > { %608 = vst.msk [vmem:[#allocation2] sm:$0xff] %vm607_vm3, %v600_v24 }
 0x284   : > { %v602_v25 = vpop.permute.xlu1 %601 }
 0x285   : > { %v1465_v28 = vsel %vm593_vm15, %v600_v24, %v602_v25  ;;  %610 = vst.msk [vmem:[#allocation2 + $0x10] sm:$0xff] %vm593_vm15, %v602_v25 }
 0x286   : > { %v629_v39 = vmul.f32 %v1465_v28, %v1362_v19  ;;  %v623_v19 = vmul.f32 %v1465_v28, %v1385_v30  ;;  %v617_v30 = vmul.f32 %v1465_v28, %v1398_v37 }
 0x288   : > { %v1468_v29 = vld [vmem:[#allocation2] sm:$0xff] }
 0x289   : > { %670 = vrot.lane.b32.xlu0 %v1468_v29, %s1161_s19  ;;  %706 = vrot.lane.b32.xlu1 %v1468_v29, %s1162_s26  ;;  %v625_v31 = vmul.f32 %v1468_v29, %v1351_v15  ;;  %v628_v36 = vmul.f32 %v1468_v29, %v1349_v14  ;;  %v622_v44 = vmul.f32 %v1468_v29, %v1377_v26 }
 0x28a   : > { %v626_v14 = vmul.f32 %v1465_v28, %v1367_v21  ;;  %v616_v26 = vmul.f32 %v1468_v29, %v1392_v33  ;;  %v620_v21 = vmul.f32 %v1465_v28, %v1413_v43  ;;  %v740_v33 = vld [vmem:[%s1587_s5] sm:$0xff] }
 0x28b   : > { %v1031_v15 = vpack.i.bf16 %v629_v39, %v628_v36 }
 0x28c   : > { %v615_v32 = vld [vmem:[#allocation2 + $0x10] sm:$0xff] }
 0x28d   : > { %696 = vrot.lane.b32.xlu0 %v625_v31, %s1163_s15  ;;  %v1021_v35 = vpack.i.bf16 %v615_v32, %v1465_v28  ;;  %v630_v38 = vmul.f32 %v615_v32, %v1356_v17  ;;  %v627_v40 = vmul.f32 %v615_v32, %v1358_v18  ;;  %v624_v45 = vmul.f32 %v615_v32, %v1379_v27 }
 0x28e   : > { %v621_v18 = vmul.f32 %v615_v32, %v1409_v42  ;;  %v618_v27 = vmul.f32 %v615_v32, %v1394_v34  ;;  %v619_v42 = vmul.f32 %v1468_v29, %v1407_v41 }
 0x28f   : > { %1022 = vrot.lane.b32.xlu1 %v1021_v35, %s1162_s26  ;;  %v1036_v17 = vpack.i.bf16 %v627_v40, %v626_v14  ;;  %v1041_v46 = vpack.i.bf16 %v624_v45, %v623_v19 }
 0x290   : > { %v1051_v47 = vpack.i.bf16 %v621_v18, %v620_v21  ;;  %v1046_v48 = vpack.i.bf16 %v618_v27, %v617_v30  ;;  %v613_v30 = vmul.f32 %v1468_v29, %v1323_v7 }
 0x291   : > { %1027 = vrot.lane.b32.xlu0 %v1021_v35, %s1161_s19 }
 0x293   : > { %723 = vrot.lane.b32.xlu1 %v630_v38, %s1164_s13 }
 0x295   : > { %1032 = vrot.lane.b32.xlu0 %v1031_v15, %s1164_s13  ;;  %s324_s13 = sld [smem:[#allocation3]] }
 0x297   : > { %683 = vrot.lane.b32.xlu1 %v622_v44, %s1165_s14 }
 0x299   : > { %1037 = vrot.lane.b32.xlu0 %v1036_v17, %s1163_s15 }
 0x29b   : > { %1042 = vrot.lane.b32.xlu1 %v1041_v46, %s1165_s14  ;;  %s908_s14 = sadd.f32 -1.0, %s324_s13 }
 0x29d   : > { %647 = vrot.lane.b32.xlu0 %v616_v26, %s1166_s24 }
 0x29f   : > { %1052 = vrot.lane.b32.xlu1 %v1051_v47, %s1168_s25 }
 0x2a1   : > { %1047 = vrot.lane.b32.xlu0 %v1046_v48, %s1166_s24  ;;  %s903_s24 = sshll.u32 %s1307_s11, 4 }
 0x2a3   : > { %660 = vrot.lane.b32.xlu1 %v619_v42, %s1168_s25  ;;  %v614_v42 = vmul.f32 %v1465_v28, %v1326_v9  ;;  %v802_v28 = vstv %s324_s13  ;;  %s914_s25 = sshll.u32 %s1242_s0, 8  ;;  %s1172_s0 = smov [#allocation7]  }
 0x2a4   : > { %s826_s22 = scalar_lea.hbm %s1590_s8, %s914_s25  ;;  %s1093_s19 = sshll.u32 %s1172_s0, 4  ;;  %s1094_s19 = int_to_ptr.vmem [resolvable:$false] %s1093_s19 }
 0x2a5   : > { %1057 = vrot.lane.b32.xlu0 %v1021_v35, %s1169_s27  ;;  %s1095_s26 = scalar_lea.vmem %s1094_s19, 512 }
 0x2a7   : > { %634 = vrot.lane.b32.xlu1 %v1468_v29, %s1169_s27  ;;  %s322_s27 = scalar_lea.vmem [#allocation7], %s903_s24 }
 0x2a8   : > { %s828_s28 = sshll.u32 %s322_s27, 4  ;;  %s829_s28 = int_to_ptr.vmem [resolvable:$true] %s828_s28 }
 0x2a9   : > { %743 = vperm.xlu0 %1020, %v740_v33   ;;  %s1089_s21 = scalar_lea.vmem %s829_s28, 256  ;;  %p1096_p1 = scmp.lt.s32.totalorder %s829_s28, %s1094_s19 }
 0x2aa   : > { %p1090_p11 = scmp.ne.s32.totalorder %s829_s28, %s1089_s21  ;;  %p1097_p3 = scmp.lt.s32.totalorder %s1095_s26, %s1089_s21 }
 0x2ac   : > { %p1091_p13 = pnand %p1090_p11, %p1601_p12  ;;  %p1098_p8 = por %p1097_p3, %p1096_p1 }
 0x2ae   : > { %p1092_p0 = pneg %p1091_p13 }
 0x2b0   : > { %p1099_p10 = pnand %p1098_p8, %p1092_p0 }
 0x2fb   : > { %v671_v34 = vpop.permute.xlu0 %670  ;;  %v707_v37 = vpop.permute.xlu1 %706 }
 0x2ff   : > { %v697_v43 = vpop.permute.xlu0 %696 }
 0x301   : > { %v1023_v49 = vpop.permute.xlu1 %1022 }
 0x302   : > { %v1025_v55 = vunpack.i.h.bf16 %v1023_v49  ;;  %v1024_v53 = vunpack.i.l.bf16 %v1023_v49  ;;  %v739_v49 = vld [vmem:[%s1586_s4] sm:$0xf] }
 0x303   : > { %v1028_v50 = vpop.permute.xlu0 %1027 }
 0x304   : > { %v1030_v62 = vunpack.i.h.bf16 %v1028_v50  ;;  %v1029_v63 = vunpack.i.l.bf16 %v1028_v50  ;;  %v713_v3 = vsel %vm499_vm6, %v1024_v53, %v1025_v55  ;;  %v712_v13 = vsel %vm499_vm6, %v707_v37, %v1024_v53 }
 0x305   : > { %v724_v51 = vpop.permute.xlu1 %723 }
 0x306   : > { %v677_v22 = vsel %vm460_vm9, %v1029_v63, %v1030_v62  ;;  %v676_v39 = vsel %vm460_vm9, %v671_v34, %v1029_v63 }
 0x307   : > { %v1033_v52 = vpop.permute.xlu0 %1032 }
 0x308   : > { %v1035_v41 = vunpack.i.h.bf16 %v1033_v52  ;;  %v1034_v54 = vunpack.i.l.bf16 %v1033_v52  ;;  %v806_v52 = vstv %s908_s14 }
 0x309   : > { %v684_v56 = vpop.permute.xlu1 %683 }
 0x30a   : > { %v726_v57 = vsel %vm513_vm5, %v1035_v41, %v724_v51  ;;  %v725_v58 = vsel %vm513_vm5, %v1034_v54, %v1035_v41 }
 0x30b   : > { %v1038_v59 = vpop.permute.xlu0 %1037  ;;  %v738_v60 = vpack.c.bf16 %v726_v57, %v726_v57  ;;  %v737_v61 = vpack.c.bf16 %v725_v58, %v725_v58 }
 0x30c   : > { %v1040_v0 = vunpack.i.h.bf16 %v1038_v59  ;;  %v1039_v1 = vunpack.i.l.bf16 %v1038_v59 }
 0x30d   : > { %906 = vmatprep.subr.msk.bf16.mxu1 %vm539_vm7, %v738_v60  ;;  %v750_v2 = vsel %vm539_vm7, %v737_v61, 0  ;;  %v1043_v10 = vpop.permute.xlu1 %1042  ;;  %v804_v60 = vmul.f32 %v802_v28, %v1461_v23 }
 0x30e   : > { %762 = vmatpush1.bf16.msra.mxu1 %v750_v2  ;;  %v1045_v4 = vunpack.i.h.bf16 %v1043_v10  ;;  %v1044_v5 = vunpack.i.l.bf16 %v1043_v10  ;;  %v703_v6 = vsel %vm488_vm8, %v1039_v1, %v1040_v0  ;;  %v702_v8 = vsel %vm488_vm8, %v697_v43, %v1039_v1 }
 0x30f   : > { %v648_v11 = vpop.permute.xlu0 %647  ;;  %v736_v12 = vpack.c.bf16 %v713_v3, %v703_v6  ;;  %v735_v16 = vpack.c.bf16 %v712_v13, %v702_v8 }
 0x310   : > { %v690_v24 = vsel %vm474_vm10, %v1044_v5, %v1045_v4  ;;  %v689_v32 = vsel %vm474_vm10, %v684_v56, %v1044_v5  ;;  %v803_v56 = vmul.f32 %v802_v28, %v1458_v20 }
 0x311   : > { %763 = vmatprep.subr.bf16.mxu1 %v736_v12  ;;  %v1053_v25 = vpop.permute.xlu1 %1052  ;;  %v734_v31 = vpack.c.bf16 %v690_v24, %v677_v22  ;;  %v733_v44 = vpack.c.bf16 %v689_v32, %v676_v39 }
 0x312   : > { %v1055_v35 = vunpack.i.h.bf16 %v1053_v25  ;;  %v1054_v36 = vunpack.i.l.bf16 %v1053_v25  ;;  %764 = vmatpush1.bf16.msra.mxu1 %v735_v16 }
 0x313   : > { %v1048_v38 = vpop.permute.xlu0 %1047  ;;  %765 = vmatprep.subr.bf16.mxu1 %v734_v31 }
 0x314   : > { %v1050_v15 = vunpack.i.h.bf16 %v1048_v38  ;;  %v1049_v40 = vunpack.i.l.bf16 %v1048_v38  ;;  %v667_v46 = vsel %vm449_vm12, %v1054_v36, %v1055_v35 }
 0x315   : > { %v661_v14 = vpop.permute.xlu1 %660 }
 0x316   : > { %v653_v45 = vsel %vm435_vm11, %v648_v11, %v1049_v40  ;;  %v666_v17 = vsel %vm449_vm12, %v661_v14, %v1054_v36  ;;  %766 = vmatpush1.bf16.msra.mxu1 %v733_v44  ;;  %v654_v19 = vsel %vm435_vm11, %v1049_v40, %v1050_v15 }
 0x317   : > { %v731_v18 = vpack.c.bf16 %v666_v17, %v653_v45  ;;  %v1058_v26 = vpop.permute.xlu0 %1057  ;;  %v732_v21 = vpack.c.bf16 %v667_v46, %v654_v19 }
 0x318   : > { %v1060_v27 = vunpack.i.h.bf16 %v1058_v26  ;;  %v1059_v47 = vunpack.i.l.bf16 %v1058_v26 }
 0x319   : > { %767 = vmatprep.subr.bf16.mxu1 %v732_v21  ;;  %v635_v48 = vpop.permute.xlu1 %634 }
 0x31a   : > { %v640_v33 = vsel %vm421_vm13, %v635_v48, %v1059_v47  ;;  %768 = vmatpush1.bf16.msra.mxu1 %v731_v18  ;;  %v641_v34 = vsel %vm421_vm13, %v1059_v47, %v1060_v27 }
 0x31b   : > { %v729_v37 = vpack.c.bf16 %v640_v33, %v613_v30  ;;  %v730_v43 = vpack.c.bf16 %v641_v34, %v614_v42 }
 0x31d   : > { %769 = vmatprep.subr.bf16.mxu1 %v730_v43 }
 0x31e   : > { %770 = vmatpush1.bf16.msra.mxu1 %v729_v37 }
 0x321   : > { %907 = vmatmul.mubr.msk.bf16.vlgmr.msra.gmra.mxu1 %vm535_vm14, %v739_v49 }
 0x324   : > { %v744_v7 = vpop.permute.xlu0 %743 }
 0x3e1   : > { %v789_v29 = vpop.f32.mrf.mxu1 }
 0x3e2   : > { %v790_v9 = vadd.f32 %v789_v29, %v744_v7 }
 0x3e3   : > { %v791_v50 = vpop.f32.mrf.mxu1 }
 0x3e4   : > { %vm796_vm4 = vcmp.ge.f32.partialorder %v790_v9, 0.0  ;;  %v798_v51 = vmul.f32 0.0001, %v790_v9  ;;  %v792_v41 = vadd.f32 %v791_v50, %v744_v7 }
 0x3e5   : > { %v793_v54 = vpop.f32.mrf.mxu1 }
 0x3e6   : > { %v800_v55 = vsel %vm796_vm4, %v790_v9, %v798_v51  ;;  %vm797_vm5 = vcmp.ge.f32.partialorder %v792_v41, 0.0  ;;  %v799_v53 = vmul.f32 0.0001, %v792_v41 }
 0x3e7   : > { %v807_v57 = vmul.f32 %v806_v52, %v800_v55  ;;  %v794_v58 = vpop.f32.mrf.mxu1 }
 0x3e8   : > { %v801_v59 = vsel %vm797_vm5, %v792_v41, %v799_v53 }
 0x3e9   : > { %v809_v61 = vadd.f32 %v807_v57, %v803_v56  ;;  %v808_v62 = vmul.f32 %v806_v52, %v801_v59 }
 0x3eb   : > { %v810_v63 = vadd.f32 %v808_v62, %v804_v60  ;;  %811 = vst [vmem:[%s322_s27] sm:$0xff] %v809_v61 }
 0x3ed   : > { %812 = vst [vmem:[%s322_s27 + $0x8] sm:$0xff] %v810_v63 }
 0x3ee   : > { %1102 = shalt.err (!%p1099_p10)
}
 0x3ef   : > { %s1103_s15 = scalar_lea.hbm %s826_s22, 256  ;;  %s1107_s14 = scalar_lea.hbm %s1590_s8, 512 }
 0x3f0   : > { %p1104_p2 = scmp.ne.s32.totalorder %s826_s22, %s1103_s15  ;;  %p1108_p7 = scmp.lt.s32.totalorder %s826_s22, %s1590_s8 }
 0x3f1   : > { %p1109_p5 = scmp.lt.s32.totalorder %s1107_s14, %s1103_s15 }
 0x3f2   : > { %p1105_p4 = pnand %p1104_p2, %p1601_p12 }
 0x3f3   : > { %p1110_p6 = por %p1109_p5, %p1108_p7 }
 0x3f4   : > { %p1106_p9 = pneg %p1105_p4 }
 0x3f6   : > { %p1111_p11 = pnand %p1110_p6, %p1106_p9 }
 0x3f8   : > { %1114 = shalt.err (!%p1111_p11)
}
 0x3f9   : > { %920 = dma.vmem_to_hbm [thread:$0]  (%p1601_p12), %s829_s28, 256, %s826_s22, %s814_s23  }
 0x3fa PF: > { %s840_s27 = sand.u32 1, %s1141_s29   ;;  %p1602_p13 = scmp.ne.s32.totalorder %s1596_s18, 0 }
 0x3fb   : > { %p1603_p0 = scmp.ge.s32.totalorder %s1153_s10, 2  ;;  %s841_s20 = scalar_lea.sflag [#allocation6], %s840_s27 }
 0x3fd   : > { %p927_p1 = pnand %p1603_p0, %p1602_p13 }
 0x3ff   : > { %p928_p3 = pneg %p927_p1 }
 0x401   : > { %1136 = dma.done.wait (%p928_p3), %s841_s20, 256  }
 0x402   : > { %1138 = vsyncadd (%p928_p3), %s841_s20, 4294967040  ;;  %s1604_s16 = sld [smem:[#allocation10_spill]]  ;;  %p22_p8 = scmp.ge.s32.totalorder %s1246_s12, 4  }
 0x403   : > { %s1605_s29 = smov %s1145_s30  ;;  %s1606_s30 = smov %s1149_s9 }
 0x404   : > { %s1608_s10 = smov %s1246_s12  ;;  %24 = sbr.rel (!%p22_p8) target bundleno = 7 (0x7), region = 97 }
 0x408   : > { %s1607_s9 = smov %s1604_s16 }
 0x409   :  { %846 = vsyncpa [#allocation5], 1 }
 0x40a   :  { %848 = vsyncpa [#allocation5 + $0x1], 1 }
 0x40b   :  { %849 = vsyncpa [#allocation6], 1 }
 0x40c   :  { %851 = vsyncpa [#allocation6 + $0x1], 1 }

</bundles_post_ra>
